<compile_context>
chip_gen: v5e
topology: v5e:2x2
jax: 0.10.0
libtpu: 0.0.40
codegen_flags: <defaults>
</compile_context>

<pallas_src>
import functools

import jax
import jax.numpy as jnp
import numpy as np
from jax.experimental import pallas as pl
from jax.experimental.pallas import tpu as pltpu
from jax.scipy.linalg import block_diag


def _round_up(x, m):
    return ((x + m - 1) // m) * m


def _pick_tile(b, tb_max=1024):
    """Row tile.

    * small problems: one tile covering every row (rounded for sublane packing)
    * B >= 256: at least two 128-aligned tiles so the 'parallel' grid axis can
      shard across v7x's two TensorCores; tb_max=1024 amortizes the ~0.35us
      per-grid-step overhead for large B (VMEM is a non-issue at these dims).
    """
    if b < 256:
        return _round_up(b, 16)
    return min(tb_max, _round_up((b + 1) // 2, 128))


# ----------------------------- Pallas kernel --------------------------------
def v_kernel(state_ref, hid_ref, act_ref,
             w1h_ref, w1a_ref, b1_ref,
             w2_ref, b2_ref,
             w3_ref, b3_ref,
             w4_ref, b4_ref,
             w5t_ref, b5_ref,
             out_ref, cat_ref, *, n_agents, s_dim, compute_dtype):
    """One row-tile (tb rows) of the full forward pass.

    state_ref : (tb, S)        compute_dtype
    hid_ref   : (tb, N*H)      per-agent hidden features packed along lanes
    act_ref   : (tb, N*A)      per-agent action features packed along lanes
    w1h_ref   : (N*H, N*HA)    block-diagonal hidden part of layer-1 weight
    w1a_ref   : (N*A, N*HA)    block-diagonal action part of layer-1 weight
    b1_ref    : (1, N*HA)      layer-1 bias tiled per agent (f32)
    w2_ref    : (N*HA, HA)     layer-2 weight stacked N times (agent-sum fold)
    w3_ref    : (S+HA, Q)      merged [w3_state; w3_enc]
    w5t_ref   : (1, Q)         final weight transposed (f32, VPU reduce)
    out_ref   : (1, tb)        lane-dense output row
    cat_ref   : (tb, S+HA)     VMEM scratch holding cat([state, enc], -1)
    """
    f32 = jnp.float32
    cd = compute_dtype

    # -- hidden_encoding layer 1: two block-diagonal matmuls over the packed
    #    per-agent features, one bias add, one ReLU (f32 math).
    pre = (jnp.dot(hid_ref[...], w1h_ref[...], preferred_element_type=f32)
           + jnp.dot(act_ref[...], w1a_ref[...], preferred_element_type=f32)
           + b1_ref[...])                                       # (tb, N*HA) f32
    h = jnp.maximum(pre, 0.0).astype(cd)

    # -- layer 2 folded through the agent sum:
    #    sum_n(h_n @ w2 + b2) == h_packed @ vstack([w2]*N) + N*b2
    enc = (jnp.dot(h, w2_ref[...], preferred_element_type=f32)
           + n_agents * b2_ref[...])                            # (tb, HA) f32

    # -- v MLP: cat([state, enc], -1) packed into a VMEM slab -> ONE w3 matmul
    cat_ref[:, :s_dim] = state_ref[...]
    cat_ref[:, s_dim:] = enc.astype(cd)
    z = jnp.maximum(
        jnp.dot(cat_ref[...], w3_ref[...], preferred_element_type=f32)
        + b3_ref[...], 0.0).astype(cd)                          # (tb, Q)
    z = jnp.maximum(
        jnp.dot(z, w4_ref[...], preferred_element_type=f32)
        + b4_ref[...], 0.0)                                     # (tb, Q) f32

    # -- final Linear(Q, 1) as a lane-axis reduce -> lane-dense (1, tb) ------
    v = jnp.sum(z * w5t_ref[...], axis=1)                       # (tb,)
    out_ref[...] = (v[None, :] + b5_ref[0, 0]).astype(out_ref.dtype)


# ------------------------------ JAX wrapper ----------------------------------
def v_forward(state, hidden, actions, params, *, tb=None,
              compute_dtype=jnp.bfloat16):
    """Pallas-backed forward of the V module.

    state  : (E, T, S)
    hidden : (E, T, N, H)
    actions: (E, T, N, A)
    returns: (E*T, 1) float32
    """
    E, T, N, H = hidden.shape
    A = actions.shape[-1]
    S = state.shape[-1]
    B = E * T
    HA = H + A
    Q = params["w4"].shape[0]
    cd = compute_dtype

    # Derived weights (tiny; built per call inside jit, negligible cost).
    w1h_bd = block_diag(*([params["w1h"]] * N)).astype(cd)     # (N*H, N*HA)
    w1a_bd = block_diag(*([params["w1a"]] * N)).astype(cd)     # (N*A, N*HA)
    b1p = jnp.tile(params["b1"], (1, N))                       # (1, N*HA) f32
    w2s = jnp.tile(params["w2"], (N, 1)).astype(cd)            # (N*HA, HA)
    w3 = jnp.concatenate([params["w3s"], params["w3h"]],
                         axis=0).astype(cd)                    # (S+HA, Q)
    w4 = params["w4"].astype(cd)

    # Glue: free reshapes only (no transpose / per-row concat copies in HBM).
    state2d = state.reshape(B, S).astype(cd)
    hid2 = hidden.reshape(B, N * H).astype(cd)
    act2 = actions.reshape(B, N * A).astype(cd)

    if tb is None:
        tb = _pick_tile(B)
    num_tiles = pl.cdiv(B, tb)
    Bp = num_tiles * tb
    # lane-dense (1, tb) output blocks of a (1, Bp) slab: tb must be the full
    # width (single tile) or a multiple of 128.
    assert num_tiles == 1 or tb % 128 == 0, "tb must be a multiple of 128"

    if Bp != B:  # pad rows so the grid covers B exactly; padded rows sliced off
        pad = Bp - B
        state2d = jnp.pad(state2d, ((0, pad), (0, 0)))
        hid2 = jnp.pad(hid2, ((0, pad), (0, 0)))
        act2 = jnp.pad(act2, ((0, pad), (0, 0)))

    kernel = functools.partial(v_kernel, n_agents=N, s_dim=S, compute_dtype=cd)

    full = lambda i: (0, 0)
    grid_spec = pltpu.PrefetchScalarGridSpec(
        num_scalar_prefetch=0,
        grid=(num_tiles,),
        in_specs=[
            pl.BlockSpec((tb, S), lambda i: (i, 0)),            # state
            pl.BlockSpec((tb, N * H), lambda i: (i, 0)),        # hidden (packed)
            pl.BlockSpec((tb, N * A), lambda i: (i, 0)),        # actions (packed)
            pl.BlockSpec((N * H, N * HA), full),                # blockdiag(w1h)
            pl.BlockSpec((N * A, N * HA), full),                # blockdiag(w1a)
            pl.BlockSpec((1, N * HA), full),                    # b1 tiled
            pl.BlockSpec((N * HA, HA), full),                   # vstack([w2]*N)
            pl.BlockSpec((1, HA), full),                        # b2
            pl.BlockSpec((S + HA, Q), full),                    # merged w3
            pl.BlockSpec((1, Q), full),                         # b3
            pl.BlockSpec((Q, Q), full),                         # w4
            pl.BlockSpec((1, Q), full),                         # b4
            pl.BlockSpec((1, Q), full),                         # w5^T
            pl.BlockSpec(memory_space=pltpu.MemorySpace.SMEM),  # b5 scalar
        ],
        out_specs=pl.BlockSpec((1, tb), lambda i: (0, i)),
        scratch_shapes=[pltpu.VMEM((tb, S + HA), cd)],
    )

    itm = jnp.dtype(cd).itemsize
    w_elems = (N * H * N * HA + N * A * N * HA + N * HA * HA
               + (S + HA) * Q + Q * Q)
    flops = 2 * B * (w_elems + Q)
    bytes_accessed = (itm * B * (S + N * H + N * A) + 4 * B
                      + itm * w_elems + 4 * (N * HA + HA + 3 * Q + 1))

    out_row = pl.pallas_call(
        kernel,
        grid_spec=grid_spec,
        out_shape=jax.ShapeDtypeStruct((1, Bp), jnp.float32),
        compiler_params=pltpu.CompilerParams(
            dimension_semantics=("parallel",)),
        cost_estimate=pl.CostEstimate(flops=int(flops), transcendentals=0,
                                      bytes_accessed=int(bytes_accessed)),
    )(state2d, hid2, act2,
      w1h_bd, w1a_bd, b1p,
      w2s, params["b2"],
      w3, params["b3"],
      w4, params["b4"],
      params["w5t"], params["b5"])

    return out_row[0, :B].reshape(B, 1)


# -------------------------- reference / params -------------------------------
def reference(state, hidden, actions, params):
    """Pure-JAX reference mirroring the (repaired) PyTorch forward."""
    E, T, N, H = hidden.shape
    A = actions.shape[-1]
    B = E * T
    st = state.reshape(B, -1)
    hid = jnp.concatenate(
        [hidden.reshape(-1, H), actions.reshape(-1, A)], axis=-1)
    w1 = jnp.concatenate([params["w1h"], params["w1a"]], axis=0)
    h = jax.nn.relu(hid @ w1 + params["b1"])
    enc = h @ params["w2"] + params["b2"]
    enc = enc.reshape(B, N, -1).sum(axis=-2)
    inputs = jnp.concatenate([st, enc], axis=-1)
    w3 = jnp.concatenate([params["w3s"], params["w3h"]], axis=0)
    z = jax.nn.relu(inputs @ w3 + params["b3"])
    z = jax.nn.relu(z @ params["w4"] + params["b4"])
    return z @ params["w5t"].T + params["b5"]


def init_params(key, *, S, H, A, Q):
    """Deterministic PyTorch-style uniform(-1/sqrt(fan_in), 1/sqrt(fan_in))."""
    HA = H + A
    V_IN = S + HA

    def linear(k, fan_in, fan_out):
        kw, kb = jax.random.split(k)
        lim = 1.0 / np.sqrt(fan_in)
        w = jax.random.uniform(kw, (fan_in, fan_out), jnp.float32, -lim, lim)
        b = jax.random.uniform(kb, (1, fan_out), jnp.float32, -lim, lim)
        return w, b

    k1, k2, k3, k4, k5 = jax.random.split(key, 5)
    w1, b1 = linear(k1, HA, HA)
    w2, b2 = linear(k2, HA, HA)
    w3, b3 = linear(k3, V_IN, Q)
    w4, b4 = linear(k4, Q, Q)
    w5, b5 = linear(k5, Q, 1)
    return {
        "w1h": w1[:H], "w1a": w1[H:], "b1": b1,
        "w2": w2, "b2": b2,
        "w3s": w3[:S], "w3h": w3[S:], "b3": b3,
        "w4": w4, "b4": b4,
        "w5t": w5.T, "b5": b5,        # w5 stored transposed (1, Q); b5 (1, 1)
    }


# --------------------------------- main ---------------------------------------
if __name__ == "__main__":
    # Small shapes implied by the forward:
    E, T, N = 2, 8, 3          # episodes, timesteps, agents
    H, A = 32, 8               # rnn_hidden_dim, n_actions
    S, Q = 24, 32              # state_shape, qtran_hidden_dim

    key = jax.random.PRNGKey(0)
    kp, ks, kh, ka = jax.random.split(key, 4)

    params = init_params(kp, S=S, H=H, A=A, Q=Q)
    state = jax.random.normal(ks, (E, T, S), jnp.float32)
    hidden = jax.random.normal(kh, (E, T, N, H), jnp.float32)
    actions = jax.random.normal(ka, (E, T, N, A), jnp.float32)

    ref = reference(state, hidden, actions, params)

    # default path: bf16 MXU operands, f32 accumulate
    out_bf16 = jax.block_until_ready(
        jax.jit(v_forward)(state, hidden, actions, params))
    assert np.all(np.isfinite(np.asarray(out_bf16)))
    np.testing.assert_allclose(np.asarray(out_bf16), np.asarray(ref),
                               rtol=1e-1, atol=2e-1)

    # f32 path, tight tolerance
    fwd_f32 = jax.jit(functools.partial(v_forward, compute_dtype=jnp.float32))
    out_f32 = jax.block_until_ready(fwd_f32(state, hidden, actions, params))
    np.testing.assert_allclose(np.asarray(out_f32), np.asarray(ref),
                               rtol=1e-4, atol=1e-4)

    # row count not divisible by the tile -> exercises cdiv + padding path
    E2, T2 = 3, 5              # B = 15
    st2 = jax.random.normal(ks, (E2, T2, S), jnp.float32)
    hd2 = jax.random.normal(kh, (E2, T2, N, H), jnp.float32)
    ac2 = jax.random.normal(ka, (E2, T2, N, A), jnp.float32)
    out2 = jax.block_until_ready(fwd_f32(st2, hd2, ac2, params))
    ref2 = reference(st2, hd2, ac2, params)
    np.testing.assert_allclose(np.asarray(out2), np.asarray(ref2),
                               rtol=1e-4, atol=1e-4)

    # multi-tile path (>=2 grid steps; v7x megacore sharding), bf16 default
    E3, T3 = 4, 80             # B = 320 -> tb = 256, 2 tiles, padded to 512
    st3 = jax.random.normal(ks, (E3, T3, S), jnp.float32)
    hd3 = jax.random.normal(kh, (E3, T3, N, H), jnp.float32)
    ac3 = jax.random.normal(ka, (E3, T3, N, A), jnp.float32)
    out3 = jax.block_until_ready(jax.jit(v_forward)(st3, hd3, ac3, params))
    ref3 = reference(st3, hd3, ac3, params)
    np.testing.assert_allclose(np.asarray(out3), np.asarray(ref3),
                               rtol=1e-1, atol=2e-1)

    print("KERNEL_OK")
</pallas_src>

<mosaic_0001>
module attributes {stable_mosaic.version = 11 : i64} {
  func.func @v_kernel(%arg0: i32, %arg1: memref<16x24xbf16, #tpu.memory_space<vmem>>, %arg2: memref<16x96xbf16, #tpu.memory_space<vmem>>, %arg3: memref<16x24xbf16, #tpu.memory_space<vmem>>, %arg4: memref<96x120xbf16, #tpu.memory_space<vmem>>, %arg5: memref<24x120xbf16, #tpu.memory_space<vmem>>, %arg6: memref<1x120xf32, #tpu.memory_space<vmem>>, %arg7: memref<120x40xbf16, #tpu.memory_space<vmem>>, %arg8: memref<1x40xf32, #tpu.memory_space<vmem>>, %arg9: memref<64x32xbf16, #tpu.memory_space<vmem>>, %arg10: memref<1x32xf32, #tpu.memory_space<vmem>>, %arg11: memref<32x32xbf16, #tpu.memory_space<vmem>>, %arg12: memref<1x32xf32, #tpu.memory_space<vmem>>, %arg13: memref<1x32xf32, #tpu.memory_space<vmem>>, %arg14: memref<1x1xf32, #tpu.memory_space<smem>>, %arg15: memref<1x16xf32, #tpu.memory_space<vmem>>, %arg16: memref<16x64xbf16, #tpu.memory_space<vmem>>) attributes {dimension_semantics = [#tpu.dimension_semantics<parallel>], iteration_bounds = array<i64: 1>, scalar_prefetch = 0 : i64, scratch_operands = 1 : i64, tpu.core_type = #tpu.core_type<tc>, window_params = [{transform_indices = @transform_0, window_bounds = array<i64: 16, 24>}, {transform_indices = @transform_1, window_bounds = array<i64: 16, 96>}, {transform_indices = @transform_2, window_bounds = array<i64: 16, 24>}, {pipeline_mode = #tpu.pipeline_mode<synchronous>, transform_indices = @transform_3, window_bounds = array<i64: 96, 120>}, {pipeline_mode = #tpu.pipeline_mode<synchronous>, transform_indices = @transform_4, window_bounds = array<i64: 24, 120>}, {pipeline_mode = #tpu.pipeline_mode<synchronous>, transform_indices = @transform_5, window_bounds = array<i64: 1, 120>}, {pipeline_mode = #tpu.pipeline_mode<synchronous>, transform_indices = @transform_6, window_bounds = array<i64: 120, 40>}, {pipeline_mode = #tpu.pipeline_mode<synchronous>, transform_indices = @transform_7, window_bounds = array<i64: 1, 40>}, {pipeline_mode = #tpu.pipeline_mode<synchronous>, transform_indices = @transform_8, window_bounds = array<i64: 64, 32>}, {pipeline_mode = #tpu.pipeline_mode<synchronous>, transform_indices = @transform_9, window_bounds = array<i64: 1, 32>}, {pipeline_mode = #tpu.pipeline_mode<synchronous>, transform_indices = @transform_10, window_bounds = array<i64: 32, 32>}, {pipeline_mode = #tpu.pipeline_mode<synchronous>, transform_indices = @transform_11, window_bounds = array<i64: 1, 32>}, {pipeline_mode = #tpu.pipeline_mode<synchronous>, transform_indices = @transform_12, window_bounds = array<i64: 1, 32>}, {transform_indices = @transform_13, window_bounds = array<i64: 1, 1>}, {transform_indices = @transform_14, window_bounds = array<i64: 1, 16>}]} {
    %c0 = arith.constant 0 : index
    %c0_0 = arith.constant 0 : index
    %0 = vector.load %arg2[%c0, %c0_0] : memref<16x96xbf16, #tpu.memory_space<vmem>>, vector<16x96xbf16>
    %c0_1 = arith.constant 0 : index
    %c0_2 = arith.constant 0 : index
    %1 = vector.load %arg4[%c0_1, %c0_2] : memref<96x120xbf16, #tpu.memory_space<vmem>>, vector<96x120xbf16>
    %cst = arith.constant dense<0.000000e+00> : vector<16x120xf32>
    %2 = tpu.matmul %0, %1, %cst {dimension_numbers = #tpu.dot_dimension_numbers<[1], [0], [0], [1], [0, 0, 1, 1], [], []>} : vector<16x96xbf16>, vector<96x120xbf16>, vector<16x120xf32> -> vector<16x120xf32>
    %c0_3 = arith.constant 0 : index
    %c0_4 = arith.constant 0 : index
    %3 = vector.load %arg3[%c0_3, %c0_4] : memref<16x24xbf16, #tpu.memory_space<vmem>>, vector<16x24xbf16>
    %c0_5 = arith.constant 0 : index
    %c0_6 = arith.constant 0 : index
    %4 = vector.load %arg5[%c0_5, %c0_6] : memref<24x120xbf16, #tpu.memory_space<vmem>>, vector<24x120xbf16>
    %cst_7 = arith.constant dense<0.000000e+00> : vector<16x120xf32>
    %5 = tpu.matmul %3, %4, %cst_7 {dimension_numbers = #tpu.dot_dimension_numbers<[1], [0], [0], [1], [0, 0, 1, 1], [], []>} : vector<16x24xbf16>, vector<24x120xbf16>, vector<16x120xf32> -> vector<16x120xf32>
    %6 = arith.addf %2, %5 : vector<16x120xf32>
    %c0_8 = arith.constant 0 : index
    %c0_9 = arith.constant 0 : index
    %7 = vector.load %arg6[%c0_8, %c0_9] : memref<1x120xf32, #tpu.memory_space<vmem>>, vector<1x120xf32>
    %8 = vector.broadcast %7 : vector<1x120xf32> to vector<16x120xf32>
    %9 = arith.addf %6, %8 : vector<16x120xf32>
    %cst_10 = arith.constant 0.000000e+00 : f32
    %10 = vector.broadcast %cst_10 : f32 to vector<16x120xf32>
    %11 = arith.maximumf %9, %10 : vector<16x120xf32>
    %12 = arith.truncf %11 : vector<16x120xf32> to vector<16x120xbf16>
    %c0_11 = arith.constant 0 : index
    %c0_12 = arith.constant 0 : index
    %13 = vector.load %arg7[%c0_11, %c0_12] : memref<120x40xbf16, #tpu.memory_space<vmem>>, vector<120x40xbf16>
    %cst_13 = arith.constant dense<0.000000e+00> : vector<16x40xf32>
    %14 = tpu.matmul %12, %13, %cst_13 {dimension_numbers = #tpu.dot_dimension_numbers<[1], [0], [0], [1], [0, 0, 1, 1], [], []>} : vector<16x120xbf16>, vector<120x40xbf16>, vector<16x40xf32> -> vector<16x40xf32>
    %c0_14 = arith.constant 0 : index
    %c0_15 = arith.constant 0 : index
    %15 = vector.load %arg8[%c0_14, %c0_15] : memref<1x40xf32, #tpu.memory_space<vmem>>, vector<1x40xf32>
    %cst_16 = arith.constant 3.000000e+00 : f32
    %16 = vector.broadcast %cst_16 : f32 to vector<1x40xf32>
    %17 = arith.mulf %16, %15 : vector<1x40xf32>
    %18 = vector.broadcast %17 : vector<1x40xf32> to vector<16x40xf32>
    %19 = arith.addf %14, %18 : vector<16x40xf32>
    %c0_17 = arith.constant 0 : index
    %c0_18 = arith.constant 0 : index
    %20 = vector.load %arg1[%c0_17, %c0_18] : memref<16x24xbf16, #tpu.memory_space<vmem>>, vector<16x24xbf16>
    %c0_19 = arith.constant 0 : index
    %c0_20 = arith.constant 0 : index
    %21 = vector.load %arg16[%c0_19, %c0_20] : memref<16x64xbf16, #tpu.memory_space<vmem>>, vector<16x24xbf16>
    tpu.vector_store %arg16[%c0_19, %c0_20], %20 {strides = array<i32>} : memref<16x64xbf16, #tpu.memory_space<vmem>>, vector<16x24xbf16>,
    %22 = arith.truncf %19 : vector<16x40xf32> to vector<16x40xbf16>
    %c0_21 = arith.constant 0 : index
    %c24 = arith.constant 24 : index
    %23 = vector.load %arg16[%c0_21, %c24] : memref<16x64xbf16, #tpu.memory_space<vmem>>, vector<16x40xbf16>
    tpu.vector_store %arg16[%c0_21, %c24], %22 {strides = array<i32>} : memref<16x64xbf16, #tpu.memory_space<vmem>>, vector<16x40xbf16>,
    %c0_22 = arith.constant 0 : index
    %c0_23 = arith.constant 0 : index
    %24 = vector.load %arg16[%c0_22, %c0_23] : memref<16x64xbf16, #tpu.memory_space<vmem>>, vector<16x64xbf16>
    %c0_24 = arith.constant 0 : index
    %c0_25 = arith.constant 0 : index
    %25 = vector.load %arg9[%c0_24, %c0_25] : memref<64x32xbf16, #tpu.memory_space<vmem>>, vector<64x32xbf16>
    %cst_26 = arith.constant dense<0.000000e+00> : vector<16x32xf32>
    %26 = tpu.matmul %24, %25, %cst_26 {dimension_numbers = #tpu.dot_dimension_numbers<[1], [0], [0], [1], [0, 0, 1, 1], [], []>} : vector<16x64xbf16>, vector<64x32xbf16>, vector<16x32xf32> -> vector<16x32xf32>
    %c0_27 = arith.constant 0 : index
    %c0_28 = arith.constant 0 : index
    %27 = vector.load %arg10[%c0_27, %c0_28] : memref<1x32xf32, #tpu.memory_space<vmem>>, vector<1x32xf32>
    %28 = vector.broadcast %27 : vector<1x32xf32> to vector<16x32xf32>
    %29 = arith.addf %26, %28 : vector<16x32xf32>
    %cst_29 = arith.constant 0.000000e+00 : f32
    %30 = vector.broadcast %cst_29 : f32 to vector<16x32xf32>
    %31 = arith.maximumf %29, %30 : vector<16x32xf32>
    %32 = arith.truncf %31 : vector<16x32xf32> to vector<16x32xbf16>
    %c0_30 = arith.constant 0 : index
    %c0_31 = arith.constant 0 : index
    %33 = vector.load %arg11[%c0_30, %c0_31] : memref<32x32xbf16, #tpu.memory_space<vmem>>, vector<32x32xbf16>
    %cst_32 = arith.constant dense<0.000000e+00> : vector<16x32xf32>
    %34 = tpu.matmul %32, %33, %cst_32 {dimension_numbers = #tpu.dot_dimension_numbers<[1], [0], [0], [1], [0, 0, 1, 1], [], []>} : vector<16x32xbf16>, vector<32x32xbf16>, vector<16x32xf32> -> vector<16x32xf32>
    %c0_33 = arith.constant 0 : index
    %c0_34 = arith.constant 0 : index
    %35 = vector.load %arg12[%c0_33, %c0_34] : memref<1x32xf32, #tpu.memory_space<vmem>>, vector<1x32xf32>
    %36 = vector.broadcast %35 : vector<1x32xf32> to vector<16x32xf32>
    %37 = arith.addf %34, %36 : vector<16x32xf32>
    %cst_35 = arith.constant 0.000000e+00 : f32
    %38 = vector.broadcast %cst_35 : f32 to vector<16x32xf32>
    %39 = arith.maximumf %37, %38 : vector<16x32xf32>
    %c0_36 = arith.constant 0 : index
    %c0_37 = arith.constant 0 : index
    %40 = vector.load %arg13[%c0_36, %c0_37] : memref<1x32xf32, #tpu.memory_space<vmem>>, vector<1x32xf32>
    %41 = vector.broadcast %40 : vector<1x32xf32> to vector<16x32xf32>
    %42 = arith.mulf %39, %41 : vector<16x32xf32>
    %cst_38 = arith.constant dense<0.000000e+00> : vector<16xf32>
    %43 = vector.multi_reduction <add>, %42, %cst_38 [1] : vector<16x32xf32> to vector<16xf32>
    %44 = vector.shape_cast %43 : vector<16xf32> to vector<1x16xf32>
    %c0_39 = arith.constant 0 : index
    %c0_40 = arith.constant 0 : index
    %45 = memref.load %arg14[%c0_39, %c0_40] : memref<1x1xf32, #tpu.memory_space<smem>>
    %46 = vector.broadcast %45 : f32 to vector<1x16xf32>
    %47 = arith.addf %44, %46 : vector<1x16xf32>
    %c0_41 = arith.constant 0 : index
    %c0_42 = arith.constant 0 : index
    %48 = vector.load %arg15[%c0_41, %c0_42] : memref<1x16xf32, #tpu.memory_space<vmem>>, vector<1x16xf32>
    tpu.vector_store %arg15[%c0_41, %c0_42], %47 {strides = array<i32>} : memref<1x16xf32, #tpu.memory_space<vmem>>, vector<1x16xf32>,
    return
  }
  func.func @transform_0(%arg0: i32) -> (i32, i32) {
    %c0_i32 = arith.constant 0 : i32
    %c0_i32_0 = arith.constant 0 : i32
    return %arg0, %c0_i32 : i32, i32
  }
  func.func @transform_1(%arg0: i32) -> (i32, i32) {
    %c0_i32 = arith.constant 0 : i32
    %c0_i32_0 = arith.constant 0 : i32
    return %arg0, %c0_i32 : i32, i32
  }
  func.func @transform_2(%arg0: i32) -> (i32, i32) {
    %c0_i32 = arith.constant 0 : i32
    %c0_i32_0 = arith.constant 0 : i32
    return %arg0, %c0_i32 : i32, i32
  }
  func.func @transform_3(%arg0: i32) -> (i32, i32) {
    %c0_i32 = arith.constant 0 : i32
    %c0_i32_0 = arith.constant 0 : i32
    %c0_i32_1 = arith.constant 0 : i32
    return %c0_i32, %c0_i32_0 : i32, i32
  }
  func.func @transform_4(%arg0: i32) -> (i32, i32) {
    %c0_i32 = arith.constant 0 : i32
    %c0_i32_0 = arith.constant 0 : i32
    %c0_i32_1 = arith.constant 0 : i32
    return %c0_i32, %c0_i32_0 : i32, i32
  }
  func.func @transform_5(%arg0: i32) -> (i32, i32) {
    %c0_i32 = arith.constant 0 : i32
    %c0_i32_0 = arith.constant 0 : i32
    %c0_i32_1 = arith.constant 0 : i32
    return %c0_i32, %c0_i32_0 : i32, i32
  }
  func.func @transform_6(%arg0: i32) -> (i32, i32) {
    %c0_i32 = arith.constant 0 : i32
    %c0_i32_0 = arith.constant 0 : i32
    %c0_i32_1 = arith.constant 0 : i32
    return %c0_i32, %c0_i32_0 : i32, i32
  }
  func.func @transform_7(%arg0: i32) -> (i32, i32) {
    %c0_i32 = arith.constant 0 : i32
    %c0_i32_0 = arith.constant 0 : i32
    %c0_i32_1 = arith.constant 0 : i32
    return %c0_i32, %c0_i32_0 : i32, i32
  }
  func.func @transform_8(%arg0: i32) -> (i32, i32) {
    %c0_i32 = arith.constant 0 : i32
    %c0_i32_0 = arith.constant 0 : i32
    %c0_i32_1 = arith.constant 0 : i32
    return %c0_i32, %c0_i32_0 : i32, i32
  }
  func.func @transform_9(%arg0: i32) -> (i32, i32) {
    %c0_i32 = arith.constant 0 : i32
    %c0_i32_0 = arith.constant 0 : i32
    %c0_i32_1 = arith.constant 0 : i32
    return %c0_i32, %c0_i32_0 : i32, i32
  }
  func.func @transform_10(%arg0: i32) -> (i32, i32) {
    %c0_i32 = arith.constant 0 : i32
    %c0_i32_0 = arith.constant 0 : i32
    %c0_i32_1 = arith.constant 0 : i32
    return %c0_i32, %c0_i32_0 : i32, i32
  }
  func.func @transform_11(%arg0: i32) -> (i32, i32) {
    %c0_i32 = arith.constant 0 : i32
    %c0_i32_0 = arith.constant 0 : i32
    %c0_i32_1 = arith.constant 0 : i32
    return %c0_i32, %c0_i32_0 : i32, i32
  }
  func.func @transform_12(%arg0: i32) -> (i32, i32) {
    %c0_i32 = arith.constant 0 : i32
    %c0_i32_0 = arith.constant 0 : i32
    %c0_i32_1 = arith.constant 0 : i32
    return %c0_i32, %c0_i32_0 : i32, i32
  }
  func.func @transform_13(%arg0: i32) -> (i32, i32) {
    %c0_i32 = arith.constant 0 : i32
    %c0_i32_0 = arith.constant 0 : i32
    %c0_i32_1 = arith.constant 0 : i32
    return %c0_i32, %c0_i32_0 : i32, i32
  }
  func.func @transform_14(%arg0: i32) -> (i32, i32) {
    %c0_i32 = arith.constant 0 : i32
    %c0_i32_0 = arith.constant 0 : i32
    return %c0_i32, %arg0 : i32, i32
  }
}

</mosaic_0001>

<bundles_post_ra>
// kernel: v_forward.1
= control target key start
LH: loop header
LB: loop body
LE: loop exit
PB: predicated region body
PF: predicated region fallthrough
CT: control target
= control target key end

     0   :  { %vm87_vm0 = vcmask 1043456   ;;  %s755_s0 = inlined_call_operand.vmem [shape: bf16[16,24], index: 0, kind: input, shape index: {}]   ;;  %s756_s1 = inlined_call_operand.vmem [shape: bf16[16,96], index: 1, kind: input, shape index: {}]   ;;  %s757_s2 = inlined_call_operand.vmem [shape: bf16[16,24], index: 2, kind: input, shape index: {}]   ;;  %s758_s3 = inlined_call_operand.vmem [shape: bf16[96,120], index: 3, kind: input, shape index: {}]   ;;  %s759_s4 = inlined_call_operand.vmem [shape: bf16[24,120], index: 4, kind: input, shape index: {}]   ;;  %s760_s5 = inlined_call_operand.vmem [shape: f32[1,120], index: 5, kind: input, shape index: {}]   ;;  %s761_s6 = inlined_call_operand.vmem [shape: bf16[120,40], index: 6, kind: input, shape index: {}]   ;;  %s762_s7 = inlined_call_operand.vmem [shape: f32[1,40], index: 7, kind: input, shape index: {}]   ;;  %s763_s8 = inlined_call_operand.vmem [shape: bf16[64,32], index: 8, kind: input, shape index: {}]   ;;  %s764_s9 = inlined_call_operand.vmem [shape: f32[1,32], index: 9, kind: input, shape index: {}]   ;;  %s765_s10 = inlined_call_operand.vmem [shape: bf16[32,32], index: 10, kind: input, shape index: {}]   ;;  %s766_s11 = inlined_call_operand.vmem [shape: f32[1,32], index: 11, kind: input, shape index: {}]   ;;  %s767_s12 = inlined_call_operand.vmem [shape: f32[1,32], index: 12, kind: input, shape index: {}]   ;;  %s768_s13 = inlined_call_operand.<no memory space> [shape: f32[1,1], index: 13, kind: input, shape index: {}]   ;;  %s769_s14 = inlined_call_operand.hbm [shape: f32[1,16], index: 14, kind: output, shape index: {}]  }
   0x1   :  { %v528_v0 = vld [vmem:[%s758_s3 + $0x28] sm:$0xff]  ;;  %v527_v3 = vld [vmem:[%s758_s3 + $0x20] sm:$0xff]  ;;  %v187_v5 = vld [vmem:[%s761_s6 + $0x38] sm:$0xf] }
   0x2   :  { %v68_v1 = vld [vmem:[%s759_s4 + $0x8] sm:$0xf]  ;;  %152 = vmatpush.bf16.msra.mxu1 %v528_v0  ;;  %v222_v6 = vunpack.c.l.b16 %v187_v5 }
   0x3   :  { %v79_v2 = vunpack.c.l.b16 %v68_v1 }
   0x5   :  { %v81_v4 = vpack.c.b16 %v79_v2, %v79_v2 }
   0x7   :  { %v89_v7 = vsel %vm87_vm0, %v81_v4, 0 }
   0x8   :  { %20 = vsyncpa [#allocation5], 0  ;;  %153 = vmatpush.bf16.msra.mxu1 %v527_v3  ;;  %97 = vmatpush.bf16.msra.mxu0 %v89_v7  ;;  %v526_v8 = vld [vmem:[%s758_s3 + $0x18] sm:$0xff]  ;;  %v530_v9 = vld [vmem:[%s759_s4] sm:$0xff]  ;;  %v230_v10 = vpack.c.b16 %v222_v6, %v222_v6  ;;  %vm83_vm1 = vcmask 195584   ;;  %vm146_vm2 = vcmask 785408  }
   0x9   :  { %v529_v12 = vld [vmem:[%s757_s2] sm:$0xff]  ;;  %v537_v13 = vld [vmem:[%s761_s6 + $0x30] sm:$0xff]  ;;  %v524_v15 = vld [vmem:[%s758_s3 + $0x8] sm:$0xff]  ;;  %vm238_vm3 = vcmask 982016   ;;  %vm261_vm4 = vcmask 191488   ;;  %vm274_vm5 = vcmask 519360  }
   0xa   :  { %v243_v11 = vsel %vm87_vm0, %v230_v10, 0  ;;  %v525_v14 = vld [vmem:[%s758_s3 + $0x10] sm:$0xff]  ;;  %v523_v16 = vld [vmem:[%s758_s3] sm:$0xff]  ;;  %v536_v18 = vld [vmem:[%s761_s6 + $0x28] sm:$0xff]  ;;  %vm320_vm6 = vcmask 523264   ;;  %vm361_vm7 = vcmask 261120  }
   0xb   :  { %245 = vmatpush.bf16.msra.mxu2 %v243_v11  ;;  %v522_v17 = vld [vmem:[%s756_s1] sm:$0xff]  ;;  %v534_v20 = vld [vmem:[%s761_s6 + $0x18] sm:$0xff]  ;;  %v533_v21 = vld [vmem:[%s761_s6 + $0x10] sm:$0xff]  ;;  %s416_s15 = sshll.u32 %s769_s14, 4  ;;  %vm404_vm8 = vcmask 130112   ;;  %vm407_vm9 = vcmask 122880   ;;  %s417_s15 = int_to_ptr.hbm [resolvable:$true] %s416_s15 }
   0xc   :  { %154 = vmatpush.bf16.msra.mxu1 %v526_v8  ;;  %98 = vmatpush.bf16.msra.mxu0 %v530_v9  ;;  %v535_v19 = vld [vmem:[%s761_s6 + $0x20] sm:$0xff]  ;;  %v532_v22 = vld [vmem:[%s761_s6 + $0x8] sm:$0xff]  ;;  %v542_v46 = vld [vmem:[%s763_s8 + $0x18] sm:$0xff] }
   0xd   :  { %v531_v23 = vld [vmem:[%s761_s6] sm:$0xff]  ;;  %328 = vmatpush.bf16.msra.mxu3 %v542_v46  ;;  %v541_v48 = vld [vmem:[%s763_s8 + $0x10] sm:$0xff]  ;;  %v540_v49 = vld [vmem:[%s763_s8 + $0x8] sm:$0xff] }
   0xe   :  { %v547_v27 = vld [vmem:[%s760_s5] ss:$0 sm:$0xff]  ;;  %s577_s5 = smov 24   ;;  %v260_v47 = vld [vmem:[%s755_s0 + $0x4] sm:$0xf]  ;;  %v544_v51 = vld [vmem:[%s765_s10 + $0x8] sm:$0xff] }
   0xf   :  { %433 = vmatmul.msk.bf16.vlgmr.msra.gmra.mxu0 %vm83_vm1, %v529_v12  ;;  %246 = vmatpush.bf16.msra.mxu2 %v537_v13  ;;  %v259_v36 = vld [vmem:[%s755_s0] sm:$0xf]  ;;  %263 = vst.msk [vmem:[#allocation2 + $0x4] sm:$0xf] %vm261_vm4, %v260_v47  ;;  %v399_v13 = vlaneseq }
  0x10   :  { %155 = vmatpush.bf16.msra.mxu1 %v525_v14  ;;  %262 = vst.msk [vmem:[#allocation2] sm:$0xf] %vm261_vm4, %v259_v36  ;;  %v188_v37 = vld [vmem:[%s762_s7] sm:$0x1]  ;;  %371 = vmatpush.bf16.msrb.mxu0 %v544_v51  ;;  %v394_v14 = vstv %s768_s13 }
  0x11   :  { %v189_v38 = vmul.f32 3.0, %v188_v37  ;;  %329 = vmatpush.bf16.msra.mxu3 %v541_v48  ;;  %v539_v50 = vld [vmem:[%s763_s8] sm:$0xff] }
  0x12   :  { %v543_v55 = vld [vmem:[%s765_s10] sm:$0xff] }
  0x13   :  { %247 = vmatpush.bf16.msra.mxu2 %v536_v18  ;;  %v191_v39 = vperm.slane %v189_v38, 0  ;;  %v548_v57 = vld [vmem:[%s764_s9] ss:$0 sm:$0xff] }
  0x14   :  { %156 = vmatpush.bf16.msra.mxu1 %v524_v15  ;;  %372 = vmatpush.bf16.msrb.mxu0 %v543_v55  ;;  %v549_v0 = vld [vmem:[%s766_s11] ss:$0 sm:$0xff]  ;;  %v400_v15 = vand.u32 127, %v399_v13 }
  0x15   :  { %330 = vmatpush.bf16.msra.mxu3 %v540_v49  ;;  %v550_v3 = vld [vmem:[%s767_s12] ss:$0 sm:$0xff]  ;;  %s578_s12 = smov [#allocation4]  }
  0x16   :  { %s414_s30 = sshll.u32 %s578_s12, 4  ;;  %s415_s30 = int_to_ptr.vmem [resolvable:$true] %s414_s30 }
  0x17   :  { %248 = vmatpush.bf16.msra.mxu2 %v535_v19 }
  0x18   :  { %157 = vmatpush.bf16.msra.mxu1 %v523_v16 }
  0x19   :  { %331 = vmatpush.bf16.msra.mxu3 %v539_v50 }
  0x1b   :  { %462 = vmatmul.msk.bf16.vlgmr.msra.gmra.mxu1 %vm146_vm2, %v522_v17  ;;  %249 = vmatpush.bf16.msra.mxu2 %v534_v20  ;;  %v402_v17 = vadd.s32 4294967288, %v400_v15 }
  0x1f   :  { %250 = vmatpush.bf16.msra.mxu2 %v533_v21 }
  0x23   :  { %251 = vmatpush.bf16.msra.mxu2 %v532_v22 }
  0x27   :  { %252 = vmatpush.bf16.msra.mxu2 %v531_v23 }
  0x8c   :  { %v100_v24 = vpop.f32.mrf.mxu0 }
  0x94   :  { %v102_v28 = vpop.f32.mrf.mxu0 }
  0x98   :  { %v159_v25 = vpop.f32.mrf.mxu1 }
  0x99   :  { %v160_v26 = vadd.f32 %v159_v25, %v100_v24 }
  0x9b   :  { %v168_v30 = vadd.f32 %v547_v27, %v160_v26 }
  0x9d   :  { %v170_v33 = vmax.f32 %v168_v30, 0.0 }
  0xa0   :  { %v161_v29 = vpop.f32.mrf.mxu1 }
  0xa1   :  { %v162_v31 = vadd.f32 %v161_v29, %v102_v28 }
  0xa3   :  { %v169_v32 = vadd.f32 %v547_v27, %v162_v31 }
  0xa5   :  { %v171_v34 = vmax.f32 %v169_v32, 0.0 }
  0xa7   :  { %v172_v35 = vpack.c.bf16 %v171_v34, %v170_v33 }
  0xa9   :  { %491 = vmatmul.msk.bf16.vlgmr.msra.gmra.mxu2 %vm238_vm3, %v172_v35 }
 0x12c   :  { %v254_v40 = vpop.f32.mrf.mxu2 }
 0x12d   :  { %v255_v41 = vadd.f32 %v254_v40, %v191_v39 }
 0x12f   :  { %v264_v42 = vpack.c.bf16 %v255_v41, %v255_v41 }
 0x131   :  { %268 = vrot.lane.b32.xlu0 %v264_v42, %s577_s5 }
 0x134   :  { %v256_v43 = vpop.f32.mrf.mxu2 }
 0x135   :  { %v257_v44 = vadd.f32 %v256_v43, %v191_v39 }
 0x137   :  { %v265_v45 = vpack.c.bf16 %v257_v44, %v257_v44 }
 0x139   :  { %270 = vrot.lane.b32.xlu0 %v265_v45, %s577_s5 }
 0x1a3   :  { %v269_v52 = vpop.permute.xlu0 %268 }
 0x1a4   :  { %275 = vst.msk [vmem:[#allocation2] sm:$0xf] %vm274_vm5, %v269_v52 }
 0x1ab   :  { %v271_v53 = vpop.permute.xlu0 %270 }
 0x1ac   :  { %276 = vst.msk [vmem:[#allocation2 + $0x4] sm:$0xf] %vm274_vm5, %v271_v53 }
 0x1b3   :  { %v538_v54 = vld [vmem:[#allocation2] sm:$0xff] }
 0x1b4   :  { %512 = vmatmul.msk.bf16.vlgmr.msra.gmra.mxu3 %vm320_vm6, %v538_v54 }
 0x237   :  { %v333_v56 = vpop.f32.mrf.mxu3 }
 0x238   :  { %v334_v58 = vadd.f32 %v548_v57, %v333_v56 }
 0x23a   :  { %v338_v61 = vmax.f32 %v334_v58, 0.0 }
 0x23f   :  { %v335_v59 = vpop.f32.mrf.mxu3 }
 0x240   :  { %v336_v60 = vadd.f32 %v548_v57, %v335_v59 }
 0x242   :  { %v339_v62 = vmax.f32 %v336_v60, 0.0 }
 0x244   :  { %v340_v63 = vpack.c.bf16 %v339_v62, %v338_v61 }
 0x246   :  { %521 = vmatmul.msk.bf16.vlgmr.msrb.gmra.mxu0 %vm361_vm7, %v340_v63 }
 0x2c3   :  { %v374_v1 = vpop.f32.mrf.mxu0 }
 0x2c4   :  { %v375_v2 = vadd.f32 %v549_v0, %v374_v1 }
 0x2c6   :  { %v379_v4 = vmax.f32 %v375_v2, 0.0 }
 0x2c8   :  { %v385_v5 = vmul.f32 %v550_v3, %v379_v4 }
 0x2ca   :  { %v387_v6 = vsel %vm361_vm7, %v385_v5, 0.0 }
 0x2cb   :  { %v376_v7 = vpop.f32.mrf.mxu0  ;;  %388 = vadd.xlane.f32.xlu1 %v387_v6 }
 0x2cc   :  { %v377_v8 = vadd.f32 %v549_v0, %v376_v7 }
 0x2ce   :  { %v380_v9 = vmax.f32 %v377_v8, 0.0 }
 0x2d0   :  { %v386_v10 = vmul.f32 %v550_v3, %v380_v9 }
 0x2d2   :  { %v390_v11 = vsel %vm361_vm7, %v386_v10, 0.0 }
 0x2d3   :  { %391 = vadd.xlane.f32.xlu1 %v390_v11 }
 0x33e   :  { %v389_v12 = vpop.xlane.xlu1 %388 }
 0x33f   :  { %v395_v16 = vadd.f32 %v394_v14, %v389_v12 }
 0x341   :  { %v401_v20 = vperm.slane %v395_v16, %v400_v15 }
 0x346   :  { %v392_v18 = vpop.xlane.xlu1 %391 }
 0x347   :  { %v396_v19 = vadd.f32 %v394_v14, %v392_v18 }
 0x349   :  { %v403_v21 = vperm.slane %v396_v19, %v402_v17 }
 0x34b   :  { %v405_v22 = vsel %vm404_vm8, %v403_v21, %v401_v20 }
 0x34c   :  { %408 = vst.msk [vmem:[#allocation4] sm:$0x1] %vm407_vm9, %v405_v22 }
 0x34d   :  { %419 = dma.vmem_to_hbm [thread:$0]  %s415_s30, 16, %s417_s15, [#allocation5]  }
 0x34e   :  { %575 = dma.done.wait [#allocation5], 16  }
 0x34f   :  { %576 = vsyncadd [#allocation5], 4294967280 }
 0x350   :  { %424 = vsyncpa [#allocation5], 1 }

</bundles_post_ra>
